<compile_context>
chip_gen: v7x
topology: tpu7x:2x2x1
jax: 0.10.0
libtpu: 0.0.40
codegen_flags: <defaults>
</compile_context>

<pallas_src>
import functools

import jax
import jax.numpy as jnp
from jax.experimental import pallas as pl
from jax.experimental.pallas import tpu as pltpu


def _round_up(x, m):
    return ((x + m - 1) // m) * m


# ------------------------------ Pallas kernel -------------------------------

def _actor_fused_kernel(x_ref, w1_ref, b1_ref, w2_ref, b2_ref, wm_ref, bm_ref,
                        mean_ref):
    """Fused l1 -> relu -> l2 -> relu -> mean_layer -> tanh on one row tile."""
    # l1 + ReLU   (bf16 MXU inputs, f32 accumulation, f32 elementwise)
    h = jnp.dot(x_ref[...].astype(jnp.bfloat16), w1_ref[...],
                preferred_element_type=jnp.float32) + b1_ref[...]
    h = jnp.maximum(h, 0.0)
    # l2 + ReLU
    h = jnp.dot(h.astype(jnp.bfloat16), w2_ref[...],
                preferred_element_type=jnp.float32) + b2_ref[...]
    h = jnp.maximum(h, 0.0)
    # mean_layer + tanh  (output dim is pre-padded to a lane-dense width)
    m = jnp.dot(h.astype(jnp.bfloat16), wm_ref[...],
                preferred_element_type=jnp.float32) + bm_ref[...]
    mean_ref[...] = jnp.tanh(m).astype(mean_ref.dtype)


# --------------------------------- wrapper ----------------------------------

@functools.partial(jax.jit, static_argnames=("tile_m",))
def actor_forward(params, obs, *, tile_m=512):
    """obs: (B, obs_dim) f32 -> (mean, std), each (B, action_dim) f32."""
    B, D = obs.shape
    H1 = params["w1"].shape[1]
    H2 = params["w2"].shape[1]
    Ap = params["wm"].shape[1]            # lane-dense (padded) action dim
    A = params["log_std"].shape[1]        # true action dim

    # Tile the batch dimension; pad B up to a multiple of the tile so every
    # block satisfies the (8, 128)/full-extent layout rule.
    tm = min(tile_m, _round_up(B, 8))
    Bp = _round_up(B, tm)
    x = obs if Bp == B else jnp.pad(obs, ((0, Bp - B), (0, 0)))

    def rows(i):            # activation / output tiles walk the M grid axis
        return (i, 0)

    def whole(i):           # weights & biases: same full block every step
        return (0, 0)

    mean = pl.pallas_call(
        _actor_fused_kernel,
        out_shape=jax.ShapeDtypeStruct((Bp, Ap), jnp.float32),
        grid=(Bp // tm,),
        in_specs=[pl.BlockSpec((tm, D), rows),
                  pl.BlockSpec((D, H1), whole), pl.BlockSpec((1, H1), whole),
                  pl.BlockSpec((H1, H2), whole), pl.BlockSpec((1, H2), whole),
                  pl.BlockSpec((H2, Ap), whole), pl.BlockSpec((1, Ap), whole)],
        out_specs=pl.BlockSpec((tm, Ap), rows),
        compiler_params=pltpu.CompilerParams(
            dimension_semantics=("parallel",)),
    )(x, params["w1"], params["b1"], params["w2"], params["b2"],
      params["wm"], params["bm"])
    mean = mean[:B, :A]

    # std = exp(clamp(log_std, -20, 2)).expand_as(mean) — independent of obs,
    # so it is computed once here (wrapper) instead of inside the kernel.
    std = jnp.broadcast_to(
        jnp.exp(jnp.clip(params["log_std"], -20.0, 2.0)), (B, A))
    return mean, std


# ---------------------------------- init ------------------------------------

def init_params(key, obs_dim, action_dim, hidden_1=128, hidden_2=128):
    ks = jax.random.split(key, 3)

    def linear(k, fan_in, fan_out):
        # nn.Linear-style U(-1/sqrt(fan_in), 1/sqrt(fan_in)) for W and b.
        kw, kb = jax.random.split(k)
        bound = float(fan_in) ** -0.5
        w = jax.random.uniform(kw, (fan_in, fan_out), jnp.float32, -bound, bound)
        b = jax.random.uniform(kb, (1, fan_out), jnp.float32, -bound, bound)
        return w, b

    w1, b1 = linear(ks[0], obs_dim, hidden_1)
    w2, b2 = linear(ks[1], hidden_1, hidden_2)
    wm, bm = linear(ks[2], hidden_2, action_dim)

    # Pad the final layer's output dim to a multiple of 128 ONCE at init so the
    # kernel's output tile is lane-dense (unmasked vst).  The padded columns
    # are zero and are sliced off in the wrapper; MXU cost is unchanged.
    a_pad = _round_up(action_dim, 128)
    wm = jnp.pad(wm, ((0, 0), (0, a_pad - action_dim)))
    bm = jnp.pad(bm, ((0, 0), (0, a_pad - action_dim)))

    return {
        # weights only feed the MXU -> store bf16 (f32 accumulation in-kernel)
        "w1": w1.astype(jnp.bfloat16), "b1": b1,
        "w2": w2.astype(jnp.bfloat16), "b2": b2,
        "wm": wm.astype(jnp.bfloat16), "bm": bm,
        # nn.Parameter(torch.zeros(1, action_dim))
        "log_std": jnp.zeros((1, action_dim), jnp.float32),
    }


if __name__ == "__main__":
    obs_dim, action_dim = 32, 4
    hidden_1, hidden_2 = 128, 128           # module defaults
    batch = 2

    key = jax.random.PRNGKey(0)
    pkey, okey = jax.random.split(key)
    params = init_params(pkey, obs_dim, action_dim, hidden_1, hidden_2)
    obs = jax.random.normal(okey, (batch, obs_dim), dtype=jnp.float32)

    mean, std = actor_forward(params, obs)
    jax.block_until_ready((mean, std))

    assert mean.shape == (batch, action_dim) and std.shape == (batch, action_dim)
    assert bool(jnp.all(jnp.isfinite(mean))) and bool(jnp.all(jnp.isfinite(std)))
    assert bool(jnp.all(jnp.abs(mean) <= 1.0)) and bool(jnp.all(std > 0.0))
    print("KERNEL_OK")
</pallas_src>

<mosaic_0001>
module attributes {stable_mosaic.version = 11 : i64} {
  func.func @_actor_fused_kernel(%arg0: i32, %arg1: memref<8x32xf32, #tpu.memory_space<vmem>>, %arg2: memref<32x128xbf16, #tpu.memory_space<vmem>>, %arg3: memref<1x128xf32, #tpu.memory_space<vmem>>, %arg4: memref<128x128xbf16, #tpu.memory_space<vmem>>, %arg5: memref<1x128xf32, #tpu.memory_space<vmem>>, %arg6: memref<128x128xbf16, #tpu.memory_space<vmem>>, %arg7: memref<1x128xf32, #tpu.memory_space<vmem>>, %arg8: memref<8x128xf32, #tpu.memory_space<vmem>>) attributes {dimension_semantics = [#tpu.dimension_semantics<parallel>], iteration_bounds = array<i64: 1>, scalar_prefetch = 0 : i64, scratch_operands = 0 : i64, tpu.core_type = #tpu.core_type<tc>, window_params = [{transform_indices = @transform_0, window_bounds = array<i64: 8, 32>}, {pipeline_mode = #tpu.pipeline_mode<synchronous>, transform_indices = @transform_1, window_bounds = array<i64: 32, 128>}, {pipeline_mode = #tpu.pipeline_mode<synchronous>, transform_indices = @transform_2, window_bounds = array<i64: 1, 128>}, {pipeline_mode = #tpu.pipeline_mode<synchronous>, transform_indices = @transform_3, window_bounds = array<i64: 128, 128>}, {pipeline_mode = #tpu.pipeline_mode<synchronous>, transform_indices = @transform_4, window_bounds = array<i64: 1, 128>}, {pipeline_mode = #tpu.pipeline_mode<synchronous>, transform_indices = @transform_5, window_bounds = array<i64: 128, 128>}, {pipeline_mode = #tpu.pipeline_mode<synchronous>, transform_indices = @transform_6, window_bounds = array<i64: 1, 128>}, {transform_indices = @transform_7, window_bounds = array<i64: 8, 128>}]} {
    %c0 = arith.constant 0 : index
    %c0_0 = arith.constant 0 : index
    %0 = vector.load %arg1[%c0, %c0_0] : memref<8x32xf32, #tpu.memory_space<vmem>>, vector<8x32xf32>
    %1 = arith.truncf %0 : vector<8x32xf32> to vector<8x32xbf16>
    %c0_1 = arith.constant 0 : index
    %c0_2 = arith.constant 0 : index
    %2 = vector.load %arg2[%c0_1, %c0_2] : memref<32x128xbf16, #tpu.memory_space<vmem>>, vector<32x128xbf16>
    %cst = arith.constant dense<0.000000e+00> : vector<8x128xf32>
    %3 = tpu.matmul %1, %2, %cst {dimension_numbers = #tpu.dot_dimension_numbers<[1], [0], [0], [1], [0, 0, 1, 1], [], []>} : vector<8x32xbf16>, vector<32x128xbf16>, vector<8x128xf32> -> vector<8x128xf32>
    %c0_3 = arith.constant 0 : index
    %c0_4 = arith.constant 0 : index
    %4 = vector.load %arg3[%c0_3, %c0_4] : memref<1x128xf32, #tpu.memory_space<vmem>>, vector<1x128xf32>
    %5 = vector.broadcast %4 : vector<1x128xf32> to vector<8x128xf32>
    %6 = arith.addf %3, %5 : vector<8x128xf32>
    %cst_5 = arith.constant 0.000000e+00 : f32
    %7 = vector.broadcast %cst_5 : f32 to vector<8x128xf32>
    %8 = arith.maximumf %6, %7 : vector<8x128xf32>
    %9 = arith.truncf %8 : vector<8x128xf32> to vector<8x128xbf16>
    %c0_6 = arith.constant 0 : index
    %c0_7 = arith.constant 0 : index
    %10 = vector.load %arg4[%c0_6, %c0_7] : memref<128x128xbf16, #tpu.memory_space<vmem>>, vector<128x128xbf16>
    %cst_8 = arith.constant dense<0.000000e+00> : vector<8x128xf32>
    %11 = tpu.matmul %9, %10, %cst_8 {dimension_numbers = #tpu.dot_dimension_numbers<[1], [0], [0], [1], [0, 0, 1, 1], [], []>} : vector<8x128xbf16>, vector<128x128xbf16>, vector<8x128xf32> -> vector<8x128xf32>
    %c0_9 = arith.constant 0 : index
    %c0_10 = arith.constant 0 : index
    %12 = vector.load %arg5[%c0_9, %c0_10] : memref<1x128xf32, #tpu.memory_space<vmem>>, vector<1x128xf32>
    %13 = vector.broadcast %12 : vector<1x128xf32> to vector<8x128xf32>
    %14 = arith.addf %11, %13 : vector<8x128xf32>
    %cst_11 = arith.constant 0.000000e+00 : f32
    %15 = vector.broadcast %cst_11 : f32 to vector<8x128xf32>
    %16 = arith.maximumf %14, %15 : vector<8x128xf32>
    %17 = arith.truncf %16 : vector<8x128xf32> to vector<8x128xbf16>
    %c0_12 = arith.constant 0 : index
    %c0_13 = arith.constant 0 : index
    %18 = vector.load %arg6[%c0_12, %c0_13] : memref<128x128xbf16, #tpu.memory_space<vmem>>, vector<128x128xbf16>
    %cst_14 = arith.constant dense<0.000000e+00> : vector<8x128xf32>
    %19 = tpu.matmul %17, %18, %cst_14 {dimension_numbers = #tpu.dot_dimension_numbers<[1], [0], [0], [1], [0, 0, 1, 1], [], []>} : vector<8x128xbf16>, vector<128x128xbf16>, vector<8x128xf32> -> vector<8x128xf32>
    %c0_15 = arith.constant 0 : index
    %c0_16 = arith.constant 0 : index
    %20 = vector.load %arg7[%c0_15, %c0_16] : memref<1x128xf32, #tpu.memory_space<vmem>>, vector<1x128xf32>
    %21 = vector.broadcast %20 : vector<1x128xf32> to vector<8x128xf32>
    %22 = arith.addf %19, %21 : vector<8x128xf32>
    %23 = math.tanh %22 : vector<8x128xf32>
    %c0_17 = arith.constant 0 : index
    %c0_18 = arith.constant 0 : index
    %24 = vector.load %arg8[%c0_17, %c0_18] : memref<8x128xf32, #tpu.memory_space<vmem>>, vector<8x128xf32>
    tpu.vector_store %arg8[%c0_17, %c0_18], %23 {strides = array<i32>} : memref<8x128xf32, #tpu.memory_space<vmem>>, vector<8x128xf32>,
    return
  }
  func.func @transform_0(%arg0: i32) -> (i32, i32) {
    %c0_i32 = arith.constant 0 : i32
    %c0_i32_0 = arith.constant 0 : i32
    return %arg0, %c0_i32 : i32, i32
  }
  func.func @transform_1(%arg0: i32) -> (i32, i32) {
    %c0_i32 = arith.constant 0 : i32
    %c0_i32_0 = arith.constant 0 : i32
    %c0_i32_1 = arith.constant 0 : i32
    return %c0_i32, %c0_i32_0 : i32, i32
  }
  func.func @transform_2(%arg0: i32) -> (i32, i32) {
    %c0_i32 = arith.constant 0 : i32
    %c0_i32_0 = arith.constant 0 : i32
    %c0_i32_1 = arith.constant 0 : i32
    return %c0_i32, %c0_i32_0 : i32, i32
  }
  func.func @transform_3(%arg0: i32) -> (i32, i32) {
    %c0_i32 = arith.constant 0 : i32
    %c0_i32_0 = arith.constant 0 : i32
    %c0_i32_1 = arith.constant 0 : i32
    return %c0_i32, %c0_i32_0 : i32, i32
  }
  func.func @transform_4(%arg0: i32) -> (i32, i32) {
    %c0_i32 = arith.constant 0 : i32
    %c0_i32_0 = arith.constant 0 : i32
    %c0_i32_1 = arith.constant 0 : i32
    return %c0_i32, %c0_i32_0 : i32, i32
  }
  func.func @transform_5(%arg0: i32) -> (i32, i32) {
    %c0_i32 = arith.constant 0 : i32
    %c0_i32_0 = arith.constant 0 : i32
    %c0_i32_1 = arith.constant 0 : i32
    return %c0_i32, %c0_i32_0 : i32, i32
  }
  func.func @transform_6(%arg0: i32) -> (i32, i32) {
    %c0_i32 = arith.constant 0 : i32
    %c0_i32_0 = arith.constant 0 : i32
    %c0_i32_1 = arith.constant 0 : i32
    return %c0_i32, %c0_i32_0 : i32, i32
  }
  func.func @transform_7(%arg0: i32) -> (i32, i32) {
    %c0_i32 = arith.constant 0 : i32
    %c0_i32_0 = arith.constant 0 : i32
    return %arg0, %c0_i32 : i32, i32
  }
}

</mosaic_0001>

<bundles_post_ra>
// kernel: actor_forward.1
= control target key start
LH: loop header
LB: loop body
LE: loop exit
PB: predicated region body
PF: predicated region fallthrough
CT: control target
= control target key end

     0   :  { %12 = vsyncpa [#allocation3], 0  ;;  %s638_s0 = inlined_call_operand.vmem [shape: f32[8,32], index: 0, kind: input, shape index: {}]   ;;  %s639_s1 = inlined_call_operand.vmem [shape: bf16[32,128], index: 1, kind: input, shape index: {}]   ;;  %s640_s2 = inlined_call_operand.vmem [shape: f32[1,128], index: 2, kind: input, shape index: {}]   ;;  %s641_s3 = inlined_call_operand.hbm [shape: bf16[128,128], index: 3, kind: input, shape index: {}]   ;;  %s642_s4 = inlined_call_operand.vmem [shape: f32[1,128], index: 4, kind: input, shape index: {}]   ;;  %s643_s5 = inlined_call_operand.hbm [shape: bf16[128,128], index: 5, kind: input, shape index: {}]   ;;  %s644_s6 = inlined_call_operand.vmem [shape: f32[1,128], index: 6, kind: input, shape index: {}]   ;;  %s645_s7 = inlined_call_operand.vmem [shape: f32[8,128], index: 7, kind: output, shape index: {}]  }
   0x1   :  { %13 = vsyncpa [#allocation5], 0  ;;  %s523_s24 = smov [#allocation2]   ;;  %s475_s28 = scalar_lea.hbm %s641_s3, 1024 }
   0x2   :  { %s25_s25 = sshll.u32 %s523_s24, 4  ;;  %p476_p0 = scmp.ne.s32.totalorder %s641_s3, %s475_s28  ;;  %s26_s25 = int_to_ptr.vmem [resolvable:$true] %s25_s25 }
   0x3   :  { %p479_p1 = scmp.lt.u32.totalorder %s475_s28, %s641_s3 }
   0x5   :  { %p481_p2 = pnand %p479_p1, %p476_p0 }
   0x7   :  { %484 = shalt.err (!%p481_p2)
}
   0x8   :  { %s485_s10 = scalar_lea.vmem %s26_s25, 1024  ;;  %p490_p4 = scmp.lt.s32.totalorder %s26_s25, %s26_s25 }
   0x9   :  { %p486_p3 = scmp.ne.s32.totalorder %s26_s25, %s485_s10  ;;  %p491_p5 = scmp.lt.s32.totalorder %s485_s10, %s485_s10 }
   0xb   :  { %p492_p6 = por %p491_p5, %p490_p4 }
   0xd   :  { %p493_p7 = pnand %p492_p6, %p486_p3 }
   0xf   :  { %496 = shalt.err (!%p493_p7)
}
  0x10   :  { %s524_s11 = smov 64   ;;  %s525_s12 = smov 4  }
  0x11   :  { %31 = dma.hbm_to_vmem [thread:$0]  %s641_s3, 1024, %s26_s25, [#allocation3], %s524_s11, %s524_s11, %s525_s12  }
  0x12   :  { %s526_s15 = smov [#allocation4]   ;;  %s497_s19 = scalar_lea.hbm %s643_s5, 1024 }
  0x13   :  { %s39_s16 = sshll.u32 %s526_s15, 4  ;;  %p498_p8 = scmp.ne.s32.totalorder %s643_s5, %s497_s19  ;;  %s40_s16 = int_to_ptr.vmem [resolvable:$true] %s39_s16 }
  0x14   :  { %p501_p9 = scmp.lt.u32.totalorder %s497_s19, %s643_s5 }
  0x16   :  { %p503_p10 = pnand %p501_p9, %p498_p8 }
  0x18   :  { %506 = shalt.err (!%p503_p10)
}
  0x19   :  { %s507_s24 = scalar_lea.vmem %s40_s16, 1024  ;;  %p512_p12 = scmp.lt.s32.totalorder %s40_s16, %s40_s16 }
  0x1a   :  { %p508_p11 = scmp.ne.s32.totalorder %s40_s16, %s507_s24  ;;  %p513_p13 = scmp.lt.s32.totalorder %s507_s24, %s507_s24 }
  0x1c   :  { %p514_p0 = por %p513_p13, %p512_p12 }
  0x1e   :  { %p515_p1 = pnand %p514_p0, %p508_p11 }
  0x20   :  { %518 = shalt.err (!%p515_p1)
}
  0x21   :  { %45 = dma.hbm_to_vmem [thread:$0]  %s643_s5, 1024, %s40_s16, [#allocation5], %s524_s11, %s524_s11, %s525_s12  }
  0x22   :  { %519 = dma.done.wait [#allocation3], 1024  }
  0x23   :  { %520 = vsyncadd [#allocation3], 4294966272 }
  0x24   :  { %521 = dma.done.wait [#allocation5], 1024  }
  0x25   :  { %522 = vsyncadd [#allocation5], 4294966272  ;;  %v527_v0 = vmov 0.0   ;;  %vm528_vm0 = vmmov 0   ;;  %v455_v1 = vld [vmem:[%s639_s1] sm:$0xff]   ;;  %v456_v2 = vld [vmem:[%s639_s1 + $0x8] sm:$0xff]  }
  0x26   :  { %401 = vmatprep.subr.bf16.mxu0 %v527_v0  ;;  %405 = vmatprep.mubr.msk.bf16.mxu0 %vm528_vm0, %v527_v0  ;;  %v55_v3 = vld [vmem:[%s638_s0] sm:$0xff]  ;;  %v458_v6 = vld [vmem:[#allocation2 + $0x8] sm:$0xff]   ;;  %vm80_vm1 = vcmask 261120   ;;  %v459_v7 = vld [vmem:[#allocation2 + $0x10] sm:$0xff]  }
  0x27   :  { %409 = vmatprep.subr.bf16.mxu1 %v527_v0  ;;  %425 = vmatprep.mubr.msk.bf16.mxu1 %vm528_vm0, %v527_v0  ;;  %v457_v4 = vld [vmem:[#allocation2] sm:$0xff]   ;;  %v56_v5 = vpack.c.bf16 %v55_v3, %v55_v3  ;;  %v460_v8 = vld [vmem:[#allocation2 + $0x18] sm:$0xff]   ;;  %v462_v10 = vld [vmem:[#allocation2 + $0x28] sm:$0xff]  }
  0x28   :  { %402 = vmatpush3.bf16.msra.mxu0 %v455_v1  ;;  %410 = vmatpush3.bf16.msra.mxu1 %v457_v4  ;;  %v461_v9 = vld [vmem:[#allocation2 + $0x20] sm:$0xff]   ;;  %v463_v11 = vld [vmem:[#allocation2 + $0x30] sm:$0xff]   ;;  %v464_v12 = vld [vmem:[#allocation2 + $0x38] sm:$0xff]  }
  0x29   :  { %403 = vmatprep.subr.bf16.mxu0 %v527_v0  ;;  %411 = vmatprep.subr.bf16.mxu1 %v527_v0  ;;  %v465_v13 = vld [vmem:[#allocation4] sm:$0xff]   ;;  %v466_v14 = vld [vmem:[#allocation4 + $0x8] sm:$0xff]   ;;  %v467_v15 = vld [vmem:[#allocation4 + $0x10] sm:$0xff]  }
  0x2a   :  { %v468_v16 = vld [vmem:[#allocation4 + $0x18] sm:$0xff]   ;;  %v469_v17 = vld [vmem:[#allocation4 + $0x20] sm:$0xff]   ;;  %v470_v18 = vld [vmem:[#allocation4 + $0x28] sm:$0xff]  }
  0x2b   :  { %v358_v19 = vld [vmem:[%s640_s2] ss:$0 sm:$0xff]  ;;  %v471_v27 = vld [vmem:[#allocation4 + $0x30] sm:$0xff]   ;;  %v472_v28 = vld [vmem:[#allocation4 + $0x38] sm:$0xff]  }
  0x2c   :  { %404 = vmatpush3.bf16.msra.mxu0 %v456_v2  ;;  %412 = vmatpush3.bf16.msra.mxu1 %v458_v6  ;;  %v362_v29 = vld [vmem:[%s642_s4] ss:$0 sm:$0xff] }
  0x2d   :  { %429 = vmatprep.subr.bf16.mxu0 %v527_v0  ;;  %413 = vmatprep.subr.bf16.mxu1 %v527_v0  ;;  %v371_v37 = vld [vmem:[%s644_s6] ss:$0 sm:$0xff] }
  0x2f   :  { %406 = vmatmul.mubr.msk.bf16.vlgmr.msra.gmra.mrb[0].mxu0 %vm80_vm1, %v56_v5 }
  0x30   :  { %445 = vmatprep.mubr.msk.bf16.mxu0 %vm528_vm0, %v527_v0  ;;  %414 = vmatpush3.bf16.msra.mxu1 %v459_v7 }
  0x31   :  { %415 = vmatprep.subr.bf16.mxu1 %v527_v0  ;;  %430 = vmatpush3.bf16.msra.mxu0 %v465_v13 }
  0x32   :  { %431 = vmatprep.subr.bf16.mxu0 %v527_v0 }
  0x34   :  { %416 = vmatpush3.bf16.msra.mxu1 %v460_v8 }
  0x35   :  { %417 = vmatprep.subr.bf16.mxu1 %v527_v0  ;;  %432 = vmatpush3.bf16.msra.mxu0 %v466_v14 }
  0x36   :  { %433 = vmatprep.subr.bf16.mxu0 %v527_v0 }
  0x38   :  { %418 = vmatpush3.bf16.msra.mxu1 %v461_v9 }
  0x39   :  { %419 = vmatprep.subr.bf16.mxu1 %v527_v0  ;;  %434 = vmatpush3.bf16.msra.mxu0 %v467_v15 }
  0x3a   :  { %435 = vmatprep.subr.bf16.mxu0 %v527_v0 }
  0x3c   :  { %420 = vmatpush3.bf16.msra.mxu1 %v462_v10 }
  0x3d   :  { %421 = vmatprep.subr.bf16.mxu1 %v527_v0  ;;  %436 = vmatpush3.bf16.msra.mxu0 %v468_v16 }
  0x3e   :  { %437 = vmatprep.subr.bf16.mxu0 %v527_v0 }
  0x40   :  { %422 = vmatpush3.bf16.msra.mxu1 %v463_v11 }
  0x41   :  { %423 = vmatprep.subr.bf16.mxu1 %v527_v0  ;;  %438 = vmatpush3.bf16.msra.mxu0 %v469_v17 }
  0x42   :  { %439 = vmatprep.subr.bf16.mxu0 %v527_v0 }
  0x44   :  { %424 = vmatpush3.bf16.msra.mxu1 %v464_v12 }
  0x45   :  { %440 = vmatpush3.bf16.msra.mxu0 %v470_v18 }
  0x46   :  { %441 = vmatprep.subr.bf16.mxu0 %v527_v0 }
  0x49   :  { %442 = vmatpush3.bf16.msra.mxu0 %v471_v27 }
  0x4a   :  { %443 = vmatprep.subr.bf16.mxu0 %v527_v0 }
  0x4d   :  { %444 = vmatpush3.bf16.msra.mxu0 %v472_v28 }
 0x102   :  { %v118_v20 = vpop.f32.mrb[0].mxu0 }
 0x103   :  { %v119_v21 = vadd.f32 %v358_v19, %v118_v20  ;;  %v407_v22 = vpop.f32.mrb[1].mxu0 }
 0x104   :  { %v121_v23 = vpop.f32.mrb[2].mxu0 }
 0x105   :  { %v124_v24 = vmax.f32 %v119_v21, 0.0  ;;  %v408_v25 = vpop.f32.mrb[3].mxu0 }
 0x107   :  { %v125_v26 = vpack.c.bf16 %v124_v24, %v124_v24 }
 0x109   :  { %426 = vmatmul.mubr.bf16.vlgmr.msra.gmra.mrb[0].mxu1 %v125_v26 }
 0x1dc   :  { %v231_v30 = vpop.f32.mrb[0].mxu1 }
 0x1dd   :  { %v232_v31 = vadd.f32 %v362_v29, %v231_v30  ;;  %v427_v32 = vpop.f32.mrb[1].mxu1 }
 0x1de   :  { %v234_v33 = vpop.f32.mrb[2].mxu1 }
 0x1df   :  { %v237_v34 = vmax.f32 %v232_v31, 0.0  ;;  %v428_v35 = vpop.f32.mrb[3].mxu1 }
 0x1e1   :  { %v238_v36 = vpack.c.bf16 %v237_v34, %v237_v34 }
 0x1e3   :  { %446 = vmatmul.mubr.bf16.vlgmr.msra.gmra.mrb[4].mxu0 %v238_v36 }
 0x2b6   :  { %v344_v38 = vpop.f32.mrb[4].mxu0 }
 0x2b7   :  { %v345_v39 = vadd.f32 %v371_v37, %v344_v38  ;;  %v447_v40 = vpop.f32.mrb[5].mxu0 }
 0x2b8   :  { %v347_v41 = vpop.f32.mrb[6].mxu0 }
 0x2b9   :  { %473 = vtanh.f32 %v345_v39  ;;  %v448_v42 = vpop.f32.mrb[7].mxu0 }
 0x2c3   :  { %v474_v43 = vpop.eup %473 }
 0x2c4   :  { %351 = vst [vmem:[%s645_s7] sm:$0xff] %v474_v43 }
 0x2c5   :  { %356 = vsyncpa [#allocation3], 1 }
 0x2c6   :  { %357 = vsyncpa [#allocation5], 1 }

</bundles_post_ra>
